<compile_context>
chip_gen: v5e
topology: v5e:2x2
jax: 0.10.0
libtpu: 0.0.40
codegen_flags: <defaults>
</compile_context>

<pallas_src>
import functools

import jax
import jax.numpy as jnp
from jax.experimental import pallas as pl
from jax.experimental.pallas import tpu as pltpu


def _rmsnorm_kernel(x_ref, w_ref, o_ref, *, eps):
    """Normalize one (tm, D) tile of token rows over the feature dim."""
    # Sum-of-squares reduction in f32 (VPU square, XLU reduce, EUP rsqrt).
    xf = x_ref[...].astype(jnp.float32)
    ms = jnp.mean(xf * xf, axis=-1, keepdims=True)            # (tm, 1)
    inv = jax.lax.rsqrt(ms + eps)
    # Re-read the input tile for the output expression so the compiler can
    # reload from the VMEM input buffer instead of carrying a (tm, D) f32 temp
    # across the reduction; extra vld is free in this mem-bound kernel.
    o_ref[...] = (
        x_ref[...].astype(jnp.float32) * inv * w_ref[...].astype(jnp.float32)
    ).astype(o_ref.dtype)


def _round_up(v, m):
    return (v + m - 1) // m * m


def _sublane_multiple(dtype) -> int:
    itemsize = jnp.dtype(dtype).itemsize
    if itemsize >= 4:
        return 8
    if itemsize == 2:
        return 16
    return 32


def _vmem_cap_bytes() -> int:
    """Upper bound for vmem_limit_bytes, leaving compiler-scratch headroom."""
    try:
        physical = int(pltpu.get_tpu_info().vmem_capacity_bytes)
    except Exception:
        physical = 128 << 20
    # v7x: 64 MiB physical per TC -> cap well below it (~44 MiB).
    # v5e/v6e: 128 MiB physical -> usual 64 MiB ceiling applies.
    return int(min(int(physical * 0.7), 64 << 20))


@functools.partial(jax.jit,
                   static_argnames=("eps", "target_tile_bytes", "max_block_rows"))
def rms_norm(x, weight, *, eps=1e-6, target_tile_bytes=4 << 20,
             max_block_rows=1024):
    """x: (..., D); weight: (D,)  ->  same shape/dtype as x."""
    orig_shape = x.shape
    D = orig_shape[-1]
    M = 1
    for s in orig_shape[:-1]:
        M *= s
    x2d = x.reshape(M, D)
    w2d = weight.reshape(1, D)

    x_itemsize = jnp.dtype(x.dtype).itemsize
    sub = _sublane_multiple(x.dtype)

    # --- Token-tile rows: multi-MiB input tiles (HBM-roofline plateau),
    # rounded to the dtype sublane multiple, capped so the grid keeps >= 2
    # steps (v7x megacore) and never exceeds the sublane-padded row count.
    rows_padded = _round_up(M, sub)
    tm = max(sub, (target_tile_bytes // max(D * x_itemsize, 1)) // sub * sub)
    tm = min(tm, _round_up(max_block_rows, sub))
    if rows_padded >= 2 * sub:          # keep both TensorCores busy on v7x
        tm = min(tm, _round_up(pl.cdiv(M, 2), sub))
    tm = min(tm, rows_padded)

    grid_steps = pl.cdiv(M, tm)         # ragged last block masked by Pallas

    # --- VMEM budget: double-buffered in/out tiles + f32 headroom + gain row.
    tile_in_bytes = tm * D * x_itemsize
    vmem_needed = (
        2 * tm * D * (x_itemsize + x_itemsize)   # in + out, double-buffered
        + tm * D * 4                             # f32 compute headroom
        + 2 * D * 4                              # gain row
    )
    vmem_limit = int(min(max(int(vmem_needed * 1.5) + (1 << 20), 32 << 20),
                         _vmem_cap_bytes()))

    # Deeper input pipelining only pays when tiles are forced to stay small
    # (tiny M and D); otherwise bigger tiles are strictly better.
    if tile_in_bytes < (512 << 10) and grid_steps >= 4:
        x_spec = pl.BlockSpec((tm, D), lambda i: (i, 0),
                              pipeline_mode=pl.Buffered(3))
    else:
        x_spec = pl.BlockSpec((tm, D), lambda i: (i, 0))

    out2d = pl.pallas_call(
        functools.partial(_rmsnorm_kernel, eps=eps),
        out_shape=jax.ShapeDtypeStruct((M, D), x.dtype),
        grid_spec=pltpu.PrefetchScalarGridSpec(
            num_scalar_prefetch=0,
            grid=(grid_steps,),
            in_specs=[
                x_spec,                                   # token tile
                pl.BlockSpec((1, D), lambda i: (0, 0)),   # gain (constant block)
            ],
            out_specs=pl.BlockSpec((tm, D), lambda i: (i, 0)),
        ),
        compiler_params=pltpu.CompilerParams(
            dimension_semantics=("parallel",),
            vmem_limit_bytes=vmem_limit,
        ),
    )(x2d, w2d)

    return out2d.reshape(orig_shape)


def rms_norm_ref(x, weight, eps=1e-6):
    xf = x.astype(jnp.float32)
    inv = jax.lax.rsqrt(jnp.mean(xf * xf, axis=-1, keepdims=True) + eps)
    return (xf * inv * weight.astype(jnp.float32)).astype(x.dtype)


if __name__ == "__main__":
    eps = 1e-6
    dim = 128
    batch, seq = 2, 8

    key = jax.random.PRNGKey(0)
    kx, kw, kx2 = jax.random.split(key, 3)
    x = jax.random.normal(kx, (batch, seq, dim), dtype=jnp.float32)
    # nn.Parameter(torch.ones(dim)); perturbed so the gain multiply is exercised.
    weight = 1.0 + 0.1 * jax.random.normal(kw, (dim,), dtype=jnp.float32)

    # f32 path (M = 16 -> two 8-row grid steps).
    out = jax.block_until_ready(rms_norm(x, weight, eps=eps))
    ref = rms_norm_ref(x, weight, eps=eps)
    assert out.shape == x.shape and out.dtype == x.dtype
    assert jnp.allclose(out, ref, atol=1e-5, rtol=1e-5)

    # Ragged row count (M = 14, tile = 8 rows): exercises the masked last block
    # that replaced the jnp.pad / output-slice round-trips.
    xr = jax.random.normal(kx2, (2, 7, dim), dtype=jnp.float32)
    outr = jax.block_until_ready(rms_norm(xr, weight, eps=eps))
    assert jnp.allclose(outr, rms_norm_ref(xr, weight, eps=eps),
                        atol=1e-5, rtol=1e-5)

    # bf16 path: compute in f32, cast back to input dtype (.type_as semantics).
    xb = x.astype(jnp.bfloat16)
    outb = jax.block_until_ready(rms_norm(xb, weight, eps=eps))
    refb = rms_norm_ref(xb, weight, eps=eps)
    assert outb.dtype == jnp.bfloat16
    assert jnp.allclose(outb.astype(jnp.float32), refb.astype(jnp.float32),
                        atol=2e-2, rtol=2e-2)

    print("KERNEL_OK")
</pallas_src>

<mosaic_0001>
module attributes {stable_mosaic.version = 11 : i64} {
  func.func @_rmsnorm_kernel(%arg0: i32, %arg1: memref<8x128xf32, #tpu.memory_space<vmem>>, %arg2: memref<1x128xf32, #tpu.memory_space<vmem>>, %arg3: memref<8x128xf32, #tpu.memory_space<vmem>>) attributes {dimension_semantics = [#tpu.dimension_semantics<parallel>], iteration_bounds = array<i64: 2>, scalar_prefetch = 0 : i64, scratch_operands = 0 : i64, tpu.core_type = #tpu.core_type<tc>, window_params = [{transform_indices = @transform_0, window_bounds = array<i64: 8, 128>}, {pipeline_mode = #tpu.pipeline_mode<synchronous>, transform_indices = @transform_1, window_bounds = array<i64: 1, 128>}, {transform_indices = @transform_2, window_bounds = array<i64: 8, 128>}]} {
    %c0 = arith.constant 0 : index
    %c0_0 = arith.constant 0 : index
    %0 = vector.load %arg1[%c0, %c0_0] : memref<8x128xf32, #tpu.memory_space<vmem>>, vector<8x128xf32>
    %1 = arith.mulf %0, %0 : vector<8x128xf32>
    %cst = arith.constant dense<0.000000e+00> : vector<8xf32>
    %2 = vector.multi_reduction <add>, %1, %cst [1] : vector<8x128xf32> to vector<8xf32>
    %3 = vector.shape_cast %2 : vector<8xf32> to vector<8x1xf32>
    %cst_1 = arith.constant 1.280000e+02 : f32
    %4 = vector.broadcast %cst_1 : f32 to vector<8x1xf32>
    %5 = arith.divf %3, %4 : vector<8x1xf32>
    %cst_2 = arith.constant 9.99999997E-7 : f32
    %6 = vector.broadcast %cst_2 : f32 to vector<8x1xf32>
    %7 = arith.addf %5, %6 : vector<8x1xf32>
    %8 = math.rsqrt %7 : vector<8x1xf32>
    %c0_3 = arith.constant 0 : index
    %c0_4 = arith.constant 0 : index
    %9 = vector.load %arg1[%c0_3, %c0_4] : memref<8x128xf32, #tpu.memory_space<vmem>>, vector<8x128xf32>
    %10 = vector.broadcast %8 : vector<8x1xf32> to vector<8x128xf32>
    %11 = arith.mulf %9, %10 : vector<8x128xf32>
    %c0_5 = arith.constant 0 : index
    %c0_6 = arith.constant 0 : index
    %12 = vector.load %arg2[%c0_5, %c0_6] : memref<1x128xf32, #tpu.memory_space<vmem>>, vector<1x128xf32>
    %13 = vector.broadcast %12 : vector<1x128xf32> to vector<8x128xf32>
    %14 = arith.mulf %11, %13 : vector<8x128xf32>
    %c0_7 = arith.constant 0 : index
    %c0_8 = arith.constant 0 : index
    %15 = vector.load %arg3[%c0_7, %c0_8] : memref<8x128xf32, #tpu.memory_space<vmem>>, vector<8x128xf32>
    tpu.vector_store %arg3[%c0_7, %c0_8], %14 {strides = array<i32>} : memref<8x128xf32, #tpu.memory_space<vmem>>, vector<8x128xf32>,
    return
  }
  func.func @transform_0(%arg0: i32) -> (i32, i32) {
    %c0_i32 = arith.constant 0 : i32
    %c0_i32_0 = arith.constant 0 : i32
    return %arg0, %c0_i32 : i32, i32
  }
  func.func @transform_1(%arg0: i32) -> (i32, i32) {
    %c0_i32 = arith.constant 0 : i32
    %c0_i32_0 = arith.constant 0 : i32
    %c0_i32_1 = arith.constant 0 : i32
    return %c0_i32, %c0_i32_0 : i32, i32
  }
  func.func @transform_2(%arg0: i32) -> (i32, i32) {
    %c0_i32 = arith.constant 0 : i32
    %c0_i32_0 = arith.constant 0 : i32
    return %arg0, %c0_i32 : i32, i32
  }
}

</mosaic_0001>

<bundles_post_ra>
// kernel: rms_norm.1
= control target key start
LH: loop header
LB: loop body
LE: loop exit
PB: predicated region body
PF: predicated region fallthrough
CT: control target
= control target key end

     0   :  { %7 = vsyncpa [#allocation3], 0  ;;  %s589_s0 = inlined_call_operand.hbm [shape: f32[16,128], index: 0, kind: input, shape index: {}]   ;;  %s590_s1 = inlined_call_operand.vmem [shape: f32[1,128], index: 1, kind: input, shape index: {}]   ;;  %s591_s2 = inlined_call_operand.hbm [shape: f32[16,128], index: 2, kind: output, shape index: {}]  }
   0x1   :  { %9 = vsyncpa [#allocation3 + $0x1], 0 }
   0x2   :  { %10 = vsyncpa [#allocation4], 0 }
   0x3   :  { %12 = vsyncpa [#allocation4 + $0x1], 0  ;;  %s455_s9 = smov 0   ;;  %s457_s10 = smov 0  }
   0x4   :  { %s459_s11 = smov 0   ;;  %s461_s12 = smov 0  }
   0x5 LB: > { %s476_s13 = sadd.s32 4294967295, %s437_s12   ;;  %s277_s14 = sadd.s32 4294967294, %s437_s12   ;;  %s437_s12 = sphi %s461_s12, %s601_s12   ;;  %s433_s11 = sphi %s459_s11, %s600_s11   ;;  %s429_s10 = sphi %s457_s10, %s599_s10   ;;  %s425_s9 = sphi %s455_s9, %s598_s9  }
   0x6   : > { %s480_s15 = sadd.s32 1, %s437_s12   ;;  %s25_s16 = sadd.s32 1, %s433_s11 }
   0x7   : > { %s22_s17 = ssub.s32 %s437_s12, %s480_s15  ;;  %p32_p0 = scmp.ne.s32.totalorder %s433_s11, %s429_s10 }
   0x8   : > { %p23_p1 = scmp.eq.s32.totalorder %s22_s17, 0  ;;  %p33_p2 = scmp.eq.s32.totalorder %s437_s12, 0 }
   0x9   : > { %p38_p3 = scmp.ne.s32.totalorder %s429_s10, %s425_s9  ;;  %p39_p4 = scmp.eq.s32.totalorder %s476_s13, 0 }
   0xa   : > { %s492_s18 = scalar_select %p23_p1, %s433_s11, %s25_s16  }
   0xb   : > { %p494_p5 = por %p33_p2, %p32_p0  ;;  %p498_p6 = por %p39_p4, %p38_p3 }
   0xc   : > { %p83_p7 = scmp.eq.s32.totalorder %s476_s13, 1  ;;  %p89_p8 = scmp.eq.s32.totalorder %s277_s14, 1 }
   0xd   : > { %p301_p10 = scmp.lt.s32.totalorder %s437_s12, 2  ;;  %s112_s23 = sand.u32 1, %s433_s11  }
   0xe   : > { %p505_p11 = por %p83_p7, %p32_p0  ;;  %p509_p12 = por %p89_p8, %p38_p3 }
   0xf   : > { %s281_s24 = sshll.u32 %s437_s12, 3  ;;  %s280_s25 = sshll.u32 %s112_s23, 3 }
  0x10   : > { %s120_s28 = scalar_lea.hbm %s589_s0, %s281_s24  ;;  %s116_s30 = scalar_lea.vmem [#allocation2], %s280_s25 }
  0x11   : > { %s122_s29 = sshll.u32 %s120_s28, 4  ;;  %s124_s3 = sshll.u32 %s116_s30, 4  ;;  %s123_s29 = int_to_ptr.hbm [resolvable:$true] %s122_s29  ;;  %s125_s3 = int_to_ptr.vmem [resolvable:$true] %s124_s3 }
  0x12   : > { %p520_p13 = pnand %p301_p10, %p494_p5  ;;  %p282_p0 = scmp.ge.s32.totalorder %s437_s12, 1 }
  0x13   : > { %p129_p1 = scmp.lt.s32.totalorder %s437_s12, 3  ;;  %s113_s5 = scalar_lea.sflag [#allocation3], %s112_s23 }
  0x14   : > { %s341_s6 = sshra.s32 %s123_s29, 4  ;;  %p345_p3 = pneg %p520_p13  ;;  %s342_s6 = int_to_ptr.hbm [resolvable:$true] %s341_s6 }
  0x15   : > { %s343_s7 = scalar_lea.hbm %s342_s6, 8  ;;  %s348_s16 = scalar_lea.hbm %s589_s0, 16 }
  0x16   : > { %p344_p2 = scmp.ne.s32.totalorder %s342_s6, %s343_s7  ;;  %p349_p5 = scmp.lt.s32.totalorder %s342_s6, %s589_s0 }
  0x17   : > { %p350_p8 = scmp.lt.s32.totalorder %s348_s16, %s343_s7 }
  0x18   : > { %p346_p4 = pnand %p345_p3, %p344_p2 }
  0x19   : > { %p351_p10 = por %p350_p8, %p349_p5 }
  0x1a   : > { %p347_p7 = pneg %p346_p4 }
  0x1c   : > { %p352_p9 = pnand %p351_p10, %p347_p7 }
  0x1e   : > { %355 = shalt.err (!%p352_p9)
}
  0x1f   : > { %296 = dma.hbm_to_vmem [thread:$0]  (!%p520_p13), %s123_s29, 128, %s125_s3, %s113_s5  }
  0x20   : > { %p130_p2 = pnand %p282_p0, %p129_p1 }
  0x21   : > { %s541_s23 = sand.u32 (!%p130_p2), 1, %s429_s10  }
  0x22   : > { %133 = sbr.rel (%p130_p2) target bundleno = 188 (0xbc), region = 28  ;;  %s283_s24 = sshll.u32 (!%p130_p2), %s541_s23, 3 }
  0x23   : > { %s136_s25 = scalar_lea.sflag (!%p130_p2), [#allocation3], %s541_s23  ;;  %s139_s26 = scalar_lea.vmem (!%p130_p2), [#allocation2], %s283_s24 }
  0x27   : > { %416 = dma.done.wait (%p498_p6), %s136_s25, 128  }
  0x28   : > { %418 = vsyncadd (%p498_p6), %s136_s25, 4294967168  ;;  %v161_v0 = vld [vmem:[%s139_s26] sm:$0xff]  ;;  %v439_v2 = vmov 128.0   ;;  %s286_s20 = sshll.u32 %s476_s13, 3  ;;  %s160_s4 = scalar_lea.vmem [#allocation5], %s283_s24 }
  0x29   : > { %v162_v1 = vmul.f32 %v161_v0, %v161_v0  ;;  %337 = vrcp.f32 %v439_v2  ;;  %s202_s29 = scalar_lea.hbm %s591_s2, %s286_s20  ;;  %v336_v18 = vld [vmem:[%s590_s1] ss:$0 sm:$0xff]  ;;  %s204_s5 = sshll.u32 %s160_s4, 4  ;;  %s205_s5 = int_to_ptr.vmem [resolvable:$true] %s204_s5 }
  0x2a   : > { %s206_s13 = sshll.u32 %s202_s29, 4  ;;  %s192_s6 = scalar_lea.sflag [#allocation4], %s541_s23  ;;  %s207_s13 = int_to_ptr.hbm [resolvable:$true] %s206_s13 }
  0x2b   : > { %163 = vadd.xlane.f32.xlu0 %v162_v1  ;;  %s385_s7 = sshra.s32 %s207_s13, 4  ;;  %s391_s17 = scalar_lea.hbm %s591_s2, 16  ;;  %s386_s7 = int_to_ptr.hbm [resolvable:$true] %s385_s7 }
  0x2c   : > { %s387_s8 = scalar_lea.hbm %s386_s7, 8  ;;  %p392_p0 = scmp.lt.s32.totalorder %s386_s7, %s591_s2 }
  0x2d   : > { %p388_p6 = scmp.ne.s32.totalorder %s386_s7, %s387_s8  ;;  %p393_p1 = scmp.lt.s32.totalorder %s391_s17, %s387_s8 }
  0x2f   : > { %v338_v3 = vpop.eup %337  ;;  %p389_p9 = pnand %p388_p6, %p505_p11  ;;  %p394_p3 = por %p393_p1, %p392_p0 }
  0x30   : > { %v166_v4 = vmul.f32 128.0, %v338_v3  ;;  %vm170_vm0 = vweird.f32 %v338_v3 }
  0x31   : > { %p390_p13 = pneg %p389_p9 }
  0x32   : > { %v167_v5 = vsub.f32 1.0, %v166_v4 }
  0x33   : > { %p395_p4 = pnand %p394_p3, %p390_p13 }
  0x34   : > { %v168_v6 = vmul.f32 %v338_v3, %v167_v5 }
  0x36   : > { %v169_v7 = vadd.f32 %v338_v3, %v168_v6 }
  0x38   : > { %v171_v8 = vsel %vm170_vm0, %v338_v3, %v169_v7 }
  0x9e   : > { %v164_v9 = vpop.xlane.xlu0 %163 }
  0x9f   : > { %v172_v10 = vmul.f32 %v171_v8, %v164_v9 }
  0xa1   : > { %v173_v11 = vadd.f32 1e-06, %v172_v10 }
  0xa3   : > { %339 = vrsqrt.f32 %v173_v11  ;;  %vm180_vm2 = vweird.f32 %v173_v11 }
  0xa9   : > { %v340_v12 = vpop.eup %339 }
  0xaa   : > { %v175_v13 = vmul.f32 %v340_v12, %v173_v11  ;;  %vm181_vm1 = vweird.f32 %v340_v12 }
  0xab   : > { %vm182_vm3 = vmor %vm180_vm2, %vm181_vm1 }
  0xac   : > { %v176_v14 = vmul.f32 %v340_v12, %v175_v13 }
  0xae   : > { %v177_v15 = vmul.f32 0.5, %v176_v14 }
  0xb0   : > { %v178_v16 = vsub.f32 1.5, %v177_v15 }
  0xb2   : > { %v179_v17 = vmul.f32 %v340_v12, %v178_v16 }
  0xb4   : > { %v183_v19 = vsel %vm182_vm3, %v340_v12, %v179_v17 }
  0xb5   : > { %v184_v20 = vmul.f32 %v183_v19, %v161_v0 }
  0xb7   : > { %v189_v21 = vmul.f32 %v336_v18, %v184_v20 }
  0xb9   : > { %190 = vst [vmem:[%s160_s4] sm:$0xff] %v189_v21 }
  0xba   : > { %398 = shalt.err (!%p395_p4)
}
  0xbb   : > { %291 = dma.vmem_to_hbm [thread:$0]  (%p505_p11), %s205_s5, 128, %s207_s13, %s192_s6  }
  0xbc PF: > { %s218_s23 = sand.u32 1, %s425_s9   ;;  %p597_p7 = scmp.ge.s32.totalorder %s437_s12, 2 }
  0xbd   : > { %s219_s25 = scalar_lea.sflag [#allocation4], %s218_s23 }
  0xbe   : > { %p298_p5 = pnand %p597_p7, %p509_p12 }
  0xc0   : > { %p299_p8 = pneg %p298_p5 }
  0xc2   : > { %420 = dma.done.wait (%p299_p8), %s219_s25, 128  }
  0xc3   : > { %422 = vsyncadd (%p299_p8), %s219_s25, 4294967168  ;;  %p15_p10 = scmp.ge.s32.totalorder %s480_s15, 4   ;;  %s598_s9 = smov %s429_s10 }
  0xc4   : > { %s599_s10 = smov %s433_s11  ;;  %s600_s11 = smov %s492_s18 }
  0xc5   : > { %s601_s12 = smov %s480_s15  ;;  %17 = sbr.rel (!%p15_p10) target bundleno = 5 (0x5), region = 73 }
  0xca   :  { %225 = vsyncpa [#allocation3], 1 }
  0xcb   :  { %227 = vsyncpa [#allocation3 + $0x1], 1 }
  0xcc   :  { %228 = vsyncpa [#allocation4], 1 }
  0xcd   :  { %230 = vsyncpa [#allocation4 + $0x1], 1 }

</bundles_post_ra>
